<compile_context>
chip_gen: v5e
topology: v5e:2x2
jax: 0.10.0
libtpu: 0.0.40
codegen_flags: <defaults>
</compile_context>

<pallas_src>
import functools
import math

import jax
import jax.numpy as jnp
import numpy as np
from jax.experimental import pallas as pl
from jax.experimental.pallas import tpu as pltpu


# --------------------------------------------------------------------------- #
# Kernel: pure elementwise add of a VMEM-resident PE tile.
# --------------------------------------------------------------------------- #
def _swin_pos_add_kernel(pe_ref, f0_ref, f1_ref, o0_ref, o1_ref, *, split_mode):
    """Blocks are (1, C, LANE_TILE); the PE block index is batch-invariant."""
    pe = pe_ref[...]                              # float32 PE tile
    f0 = f0_ref[...].astype(jnp.float32)          # load once; reused below
    f1 = f1_ref[...].astype(jnp.float32)
    if split_mode:
        o0_ref[...] = (f0 + pe).astype(o0_ref.dtype)
        o1_ref[...] = (f1 + pe).astype(o1_ref.dtype)
    else:
        # attn_splits == 1 module quirk, reproduced verbatim:
        #   position = feat0 + pe; out0 = feat0 + position; out1 = feat1 + position
        fp = f0 + pe
        o0_ref[...] = (f0 + fp).astype(o0_ref.dtype)
        o1_ref[...] = (f1 + fp).astype(o1_ref.dtype)


# --------------------------------------------------------------------------- #
# PE buffer (exactly the PyTorch module's registered buffer), host-side + cached.
# --------------------------------------------------------------------------- #
@functools.lru_cache(maxsize=32)
def _pe_window_np(d_model, h, w):
    """PositionEncodingSine's constant buffer pe[c, y, x] as float32 numpy."""
    y = np.broadcast_to(np.arange(1, h + 1, dtype=np.float32)[:, None], (h, w))
    x = np.broadcast_to(np.arange(1, w + 1, dtype=np.float32)[None, :], (h, w))
    div = np.exp(np.arange(0, d_model // 2, 2, dtype=np.float32)
                 * (-math.log(10000.0) / (d_model // 2)))[:, None, None]
    # channels [4i, 4i+1, 4i+2, 4i+3] = [sin(x*d_i), cos(x*d_i), sin(y*d_i), cos(y*d_i)]
    pe = np.stack([np.sin(x[None] * div), np.cos(x[None] * div),
                   np.sin(y[None] * div), np.cos(y[None] * div)],
                  axis=1).reshape(d_model, h, w)
    return pe


@functools.lru_cache(maxsize=32)
def _pe_full_device(c, h, w, attn_splits):
    """(1, C, H*W) float32 PE constant on device.

    For attn_splits > 1 the window PE is pre-tiled to window-local coordinates,
    which makes the kernel a plain elementwise add (no in-kernel div/mod).
    Cached so repeated calls do no on-device trig / scatter work at all.
    """
    if attn_splits > 1:
        assert h % attn_splits == 0 and w % attn_splits == 0
        pe = np.tile(_pe_window_np(c, h // attn_splits, w // attn_splits),
                     (1, attn_splits, attn_splits))
    else:
        pe = _pe_window_np(c, h, w)
    return jnp.asarray(np.ascontiguousarray(pe.reshape(1, c, h * w)),
                       dtype=jnp.float32)


# --------------------------------------------------------------------------- #
# Generation-aware tiling policy.
# --------------------------------------------------------------------------- #
def _tpu_vmem_capacity_bytes():
    try:
        return int(pltpu.get_tpu_info().vmem_capacity_bytes)
    except Exception:
        # Unknown: assume the tightest generation (v7x, 64 MiB per core).
        return 64 << 20


def _pick_lane_tile(hw, c, feat_itemsize, batch, block_budget_bytes,
                    min_steps=8, min_lanes=512):
    """Lane-dense (multiple-of-128) spatial tile.

    * never larger than the per-block byte budget (generation-aware),
    * the grid uses pl.cdiv, so the tile need NOT divide HW (Pallas masks the
      ragged last tile) -> bounded VMEM for any H, W,
    * if the grid would have < min_steps iterations, shrink the tile (never
      below min_lanes) so both v7x TensorCores get work and the DMA pipeline
      has prefetch/compute/writeback overlap.
    """
    hw_pad = pl.cdiv(hw, 128) * 128
    max_lanes = max(128, (block_budget_bytes // (c * feat_itemsize)) // 128 * 128)
    lane_tile = min(max_lanes, hw_pad)

    floor = max(128, min(min_lanes, hw_pad))
    while lane_tile - 128 >= floor and pl.cdiv(hw, lane_tile) * batch < min_steps:
        lane_tile -= 128

    if lane_tile >= hw:
        lane_tile = hw          # full-extent block: always layout-legal
    return lane_tile


# --------------------------------------------------------------------------- #
# Wrapper
# --------------------------------------------------------------------------- #
def swin_pos_encoding(feature0, feature1, *, attn_splits=2, donate_features=False):
    """feature0, feature1: (B, C, H, W) arrays (NCHW, PyTorch convention).

    donate_features=True aliases feature0->out0, feature1->out1 (halves peak
    HBM footprint); only use it when the caller no longer needs the inputs.
    """
    B, C, H, W = feature0.shape
    assert feature1.shape == feature0.shape
    assert feature0.dtype == feature1.dtype, "feature0/feature1 dtypes must match"
    assert C % 4 == 0, "feature_channels must be divisible by 4"
    HW = H * W
    split_mode = attn_splits > 1
    if split_mode:
        assert H % attn_splits == 0 and W % attn_splits == 0

    # Constant PE (float32, cached on device).  The add is done in f32 inside
    # the kernel and the result cast once to the feature dtype.
    # NOTE: for sub-f32 features PyTorch would *promote* the output to f32;
    # here outputs keep the feature dtype (single rounding after the f32 add).
    pe = _pe_full_device(C, H, W, attn_splits)

    f0 = feature0.reshape(B, C, HW)
    f1 = feature1.reshape(B, C, HW)

    itemsize = jnp.dtype(feature0.dtype).itemsize
    vmem_cap = _tpu_vmem_capacity_bytes()
    if vmem_cap <= (64 << 20):                 # v7x-class: 64 MiB per-core VMEM
        block_budget, vmem_cap_limit = 2 << 20, 40 << 20
    else:                                      # v5e / v6e: 128 MiB VMEM
        block_budget, vmem_cap_limit = 4 << 20, 64 << 20

    lane_tile = _pick_lane_tile(HW, C, itemsize, B, block_budget)
    num_s = pl.cdiv(HW, lane_tile)

    # Grid = (spatial tiles, batch); batch innermost so the PE block index
    # (constant in b) is not re-DMA'd across the batch loop and PE stays
    # VMEM-resident.  Both axes are independent -> "parallel" for megacore.
    pe_spec = pl.BlockSpec((1, C, lane_tile), lambda s, b: (0, 0, s))
    ft_spec = pl.BlockSpec((1, C, lane_tile), lambda s, b: (b, 0, s))

    kernel = functools.partial(_swin_pos_add_kernel, split_mode=split_mode)

    # Worst-case live VMEM: double-buffered pe (f32) + 2 inputs + 2 outputs.
    pe_block = C * lane_tile * 4
    ft_block = C * lane_tile * itemsize
    live = 2 * pe_block + 8 * ft_block
    vmem_limit = int(min(max(live + (2 << 20), 16 << 20), vmem_cap_limit))

    out0, out1 = pl.pallas_call(
        kernel,
        out_shape=(jax.ShapeDtypeStruct((B, C, HW), feature0.dtype),
                   jax.ShapeDtypeStruct((B, C, HW), feature1.dtype)),
        grid_spec=pltpu.PrefetchScalarGridSpec(
            num_scalar_prefetch=0,
            grid=(num_s, B),
            in_specs=[pe_spec, ft_spec, ft_spec],
            out_specs=[ft_spec, ft_spec]),
        compiler_params=pltpu.CompilerParams(
            dimension_semantics=("parallel", "parallel"),
            vmem_limit_bytes=vmem_limit),
        input_output_aliases={1: 0, 2: 1} if donate_features else {},
    )(pe, f0, f1)

    return out0.reshape(B, C, H, W), out1.reshape(B, C, H, W)


# ------------------------ pure-JAX reference (for checking) ------------------------
def _ref_pe(d_model, H, W):
    y = jnp.broadcast_to(jnp.arange(1, H + 1, dtype=jnp.float32)[:, None], (H, W))
    x = jnp.broadcast_to(jnp.arange(1, W + 1, dtype=jnp.float32)[None, :], (H, W))
    div = jnp.exp(jnp.arange(0, d_model // 2, 2, dtype=jnp.float32)
                  * (-math.log(10000.0) / (d_model // 2)))[:, None, None]
    pe = jnp.zeros((d_model, H, W), jnp.float32)
    pe = pe.at[0::4].set(jnp.sin(x[None] * div))
    pe = pe.at[1::4].set(jnp.cos(x[None] * div))
    pe = pe.at[2::4].set(jnp.sin(y[None] * div))
    pe = pe.at[3::4].set(jnp.cos(y[None] * div))
    return pe


def _ref_forward(feature0, feature1, attn_splits):
    B, C, H, W = feature0.shape
    if attn_splits > 1:
        hs, ws = H // attn_splits, W // attn_splits
        pe = _ref_pe(C, hs, ws)
        pe_tiled = jnp.tile(pe, (1, attn_splits, attn_splits))[None]
        return feature0 + pe_tiled, feature1 + pe_tiled
    else:
        pe = _ref_pe(C, H, W)[None]
        position = feature0 + pe
        return feature0 + position, feature1 + position


if __name__ == "__main__":
    B, C, H, W = 2, 32, 16, 16          # small shapes: feature_channels=32, 16x16 maps
    attn_splits = 2

    key = jax.random.PRNGKey(0)
    k0, k1 = jax.random.split(key)
    feature0 = jax.random.normal(k0, (B, C, H, W), dtype=jnp.float32)
    feature1 = jax.random.normal(k1, (B, C, H, W), dtype=jnp.float32)

    out0, out1 = swin_pos_encoding(feature0, feature1, attn_splits=attn_splits)
    out0 = jax.block_until_ready(out0)
    out1 = jax.block_until_ready(out1)

    ref0, ref1 = _ref_forward(feature0, feature1, attn_splits)
    assert jnp.allclose(out0, ref0, atol=1e-5, rtol=1e-5)
    assert jnp.allclose(out1, ref1, atol=1e-5, rtol=1e-5)

    # also exercise the attn_splits == 1 quirk path
    o0, o1 = swin_pos_encoding(feature0, feature1, attn_splits=1)
    o0 = jax.block_until_ready(o0)
    r0, r1 = _ref_forward(feature0, feature1, 1)
    assert jnp.allclose(o0, r0, atol=1e-5, rtol=1e-5)
    assert jnp.allclose(o1, r1, atol=1e-5, rtol=1e-5)

    print("KERNEL_OK")
</pallas_src>

<mosaic_0001>
module attributes {stable_mosaic.version = 11 : i64} {
  func.func @_swin_pos_add_kernel(%arg0: i32, %arg1: i32, %arg2: memref<1x32x256xf32, #tpu.memory_space<vmem>>, %arg3: memref<1x32x256xf32, #tpu.memory_space<vmem>>, %arg4: memref<1x32x256xf32, #tpu.memory_space<vmem>>, %arg5: memref<1x32x256xf32, #tpu.memory_space<vmem>>, %arg6: memref<1x32x256xf32, #tpu.memory_space<vmem>>) attributes {dimension_semantics = [#tpu.dimension_semantics<parallel>, #tpu.dimension_semantics<parallel>], iteration_bounds = array<i64: 1, 2>, scalar_prefetch = 0 : i64, scratch_operands = 0 : i64, tpu.core_type = #tpu.core_type<tc>, window_params = [{transform_indices = @transform_0, window_bounds = array<i64: 1, 32, 256>}, {transform_indices = @transform_1, window_bounds = array<i64: 1, 32, 256>}, {transform_indices = @transform_2, window_bounds = array<i64: 1, 32, 256>}, {transform_indices = @transform_3, window_bounds = array<i64: 1, 32, 256>}, {transform_indices = @transform_4, window_bounds = array<i64: 1, 32, 256>}]} {
    %c0 = arith.constant 0 : index
    %c0_0 = arith.constant 0 : index
    %c0_1 = arith.constant 0 : index
    %0 = vector.load %arg2[%c0, %c0_0, %c0_1] : memref<1x32x256xf32, #tpu.memory_space<vmem>>, vector<1x32x256xf32>
    %c0_2 = arith.constant 0 : index
    %c0_3 = arith.constant 0 : index
    %c0_4 = arith.constant 0 : index
    %1 = vector.load %arg3[%c0_2, %c0_3, %c0_4] : memref<1x32x256xf32, #tpu.memory_space<vmem>>, vector<1x32x256xf32>
    %c0_5 = arith.constant 0 : index
    %c0_6 = arith.constant 0 : index
    %c0_7 = arith.constant 0 : index
    %2 = vector.load %arg4[%c0_5, %c0_6, %c0_7] : memref<1x32x256xf32, #tpu.memory_space<vmem>>, vector<1x32x256xf32>
    %3 = arith.addf %1, %0 : vector<1x32x256xf32>
    %c0_8 = arith.constant 0 : index
    %c0_9 = arith.constant 0 : index
    %c0_10 = arith.constant 0 : index
    %4 = vector.load %arg5[%c0_8, %c0_9, %c0_10] : memref<1x32x256xf32, #tpu.memory_space<vmem>>, vector<1x32x256xf32>
    tpu.vector_store %arg5[%c0_8, %c0_9, %c0_10], %3 {strides = array<i32>} : memref<1x32x256xf32, #tpu.memory_space<vmem>>, vector<1x32x256xf32>,
    %5 = arith.addf %2, %0 : vector<1x32x256xf32>
    %c0_11 = arith.constant 0 : index
    %c0_12 = arith.constant 0 : index
    %c0_13 = arith.constant 0 : index
    %6 = vector.load %arg6[%c0_11, %c0_12, %c0_13] : memref<1x32x256xf32, #tpu.memory_space<vmem>>, vector<1x32x256xf32>
    tpu.vector_store %arg6[%c0_11, %c0_12, %c0_13], %5 {strides = array<i32>} : memref<1x32x256xf32, #tpu.memory_space<vmem>>, vector<1x32x256xf32>,
    return
  }
  func.func @transform_0(%arg0: i32, %arg1: i32) -> (i32, i32, i32) {
    %c0_i32 = arith.constant 0 : i32
    %c0_i32_0 = arith.constant 0 : i32
    %c0_i32_1 = arith.constant 0 : i32
    return %c0_i32, %c0_i32_0, %arg0 : i32, i32, i32
  }
  func.func @transform_1(%arg0: i32, %arg1: i32) -> (i32, i32, i32) {
    %c0_i32 = arith.constant 0 : i32
    %c0_i32_0 = arith.constant 0 : i32
    return %arg1, %c0_i32, %arg0 : i32, i32, i32
  }
  func.func @transform_2(%arg0: i32, %arg1: i32) -> (i32, i32, i32) {
    %c0_i32 = arith.constant 0 : i32
    %c0_i32_0 = arith.constant 0 : i32
    return %arg1, %c0_i32, %arg0 : i32, i32, i32
  }
  func.func @transform_3(%arg0: i32, %arg1: i32) -> (i32, i32, i32) {
    %c0_i32 = arith.constant 0 : i32
    %c0_i32_0 = arith.constant 0 : i32
    return %arg1, %c0_i32, %arg0 : i32, i32, i32
  }
  func.func @transform_4(%arg0: i32, %arg1: i32) -> (i32, i32, i32) {
    %c0_i32 = arith.constant 0 : i32
    %c0_i32_0 = arith.constant 0 : i32
    return %arg1, %c0_i32, %arg0 : i32, i32, i32
  }
}

</mosaic_0001>

<bundles_post_ra>
// kernel: tpu_custom_call.1
= control target key start
LH: loop header
LB: loop body
LE: loop exit
PB: predicated region body
PF: predicated region fallthrough
CT: control target
= control target key end

     0   :  { %10 = vsyncpa [#allocation3], 0  ;;  %s1143_s0 = inlined_call_operand.hbm [shape: f32[1,32,256], index: 0, kind: input, shape index: {}]   ;;  %s1144_s1 = inlined_call_operand.hbm [shape: f32[2,32,256], index: 1, kind: input, shape index: {}]   ;;  %s1145_s2 = inlined_call_operand.hbm [shape: f32[2,32,256], index: 2, kind: input, shape index: {}]   ;;  %s1146_s3 = inlined_call_operand.hbm [shape: f32[2,32,256], index: 3, kind: output, shape index: {0}]   ;;  %s1147_s4 = inlined_call_operand.hbm [shape: f32[2,32,256], index: 4, kind: output, shape index: {1}]  }
   0x1   :  { %11 = vsyncpa [#allocation6], 0 }
   0x2   :  { %13 = vsyncpa [#allocation6 + $0x1], 0 }
   0x3   :  { %14 = vsyncpa [#allocation4], 0 }
   0x4   :  { %16 = vsyncpa [#allocation4 + $0x1], 0 }
   0x5   :  { %17 = vsyncpa [#allocation10], 0 }
   0x6   :  { %19 = vsyncpa [#allocation10 + $0x1], 0  ;;  %s936_s15 = smov 0   ;;  %s938_s16 = smov 0  }
   0x7   :  { %s940_s17 = smov 0   ;;  %s942_s18 = smov 0  }
   0x8   :  { %s944_s19 = smov 0   ;;  %s946_s20 = smov 0  }
   0x9 LB: > { %s34_s21 = sadd.s32 1, %s900_s19  ;;  %s72_s22 = sadd.s32 1, %s892_s17  ;;  %s904_s20 = sphi %s946_s20, %s25_s20   ;;  %s900_s19 = sphi %s944_s19, %s1157_s19   ;;  %s896_s18 = sphi %s942_s18, %s1156_s18   ;;  %s892_s17 = sphi %s940_s17, %s1155_s17   ;;  %s888_s16 = sphi %s938_s16, %s1154_s16   ;;  %s884_s15 = sphi %s936_s15, %s1153_s15  }
   0xa   : > { %p35_p0 = scmp.ge.s32.totalorder %s34_s21, 2  ;;  %p79_p1 = scmp.ne.s32.totalorder %s892_s17, %s888_s16 }
   0xb   : > { %p80_p2 = scmp.eq.s32.totalorder %s904_s20, 0  ;;  %p584_p4 = scmp.ge.s32.totalorder %s904_s20, 2 }
   0xc   : > { %s1159_s21 = smov (%p35_p0, %s34_s21), 0  ;;  %p640_p6 = scmp.lt.s32.totalorder %s904_s20, 2 }
   0xd   : > { %p976_p3 = por %p80_p2, %p79_p1  ;;  %s67_s24 = ssub.s32 %s900_s19, %s1159_s21 }
   0xe   : > { %p70_p5 = scmp.eq.s32.totalorder %s67_s24, 0  ;;  %s210_s25 = sand.u32 1, %s904_s20  }
   0xf   : > { %s212_s26 = sand.u32 1, %s892_s17   ;;  %s605_s29 = sshll.u32 %s900_s19, 6 }
  0x10   : > { %s987_s27 = scalar_select %p70_p5, %s892_s17, %s72_s22  }
  0x11   : > { %s585_s28 = sshll.u32 %s212_s26, 6  ;;  %s221_s6 = scalar_lea.hbm %s1144_s1, %s605_s29 }
  0x12   : > { %s214_s7 = scalar_lea.vmem [#allocation5], %s585_s28  ;;  %s222_s9 = sshll.u32 %s221_s6, 4  ;;  %s223_s9 = int_to_ptr.hbm [resolvable:$true] %s222_s9 }
  0x13   : > { %s224_s8 = sshll.u32 %s214_s7, 4  ;;  %p995_p7 = pnand %p640_p6, %p976_p3  ;;  %s225_s8 = int_to_ptr.vmem [resolvable:$true] %s224_s8 }
  0x14   : > { %s245_s13 = scalar_lea.hbm %s1145_s2, %s605_s29  ;;  %s1002_s14 = scalar_lea.sflag [#allocation6], %s210_s25 }
  0x15   : > { %s906_s22 = smov 256   ;;  %s907_s24 = smov 16  }
  0x16   : > { %628 = dma.hbm_to_vmem [thread:$0]  (!%p995_p7), %s223_s9, 1024, %s225_s8, %s1002_s14, %s906_s22, %s906_s22, %s907_s24  }
  0x17   : > { %s246_s23 = sshll.u32 %s245_s13, 4  ;;  %s238_s26 = scalar_lea.vmem [#allocation7], %s585_s28  ;;  %s247_s23 = int_to_ptr.hbm [resolvable:$true] %s246_s23 }
  0x18   : > { %s248_s30 = sshll.u32 %s238_s26, 4  ;;  %s1011_s5 = sadd.s32 4294967295, %s904_s20   ;;  %s249_s30 = int_to_ptr.vmem [resolvable:$true] %s248_s30 }
  0x19   : > { %s581_s29 = sadd.s32 4294967294, %s904_s20   ;;  %p85_p8 = scmp.ne.s32.totalorder %s888_s16, %s884_s15 }
  0x1a   : > { %p86_p9 = scmp.eq.s32.totalorder %s1011_s5, 0  ;;  %p139_p10 = scmp.eq.s32.totalorder %s1011_s5, 1 }
  0x1b   : > { %p145_p11 = scmp.eq.s32.totalorder %s581_s29, 1  ;;  %p582_p12 = scmp.ge.s32.totalorder %s904_s20, 1 }
  0x1c   : > { %p1021_p13 = por %p86_p9, %p85_p8  ;;  %p1028_p0 = por %p139_p10, %p79_p1 }
  0x1d   : > { %p1032_p2 = por %p145_p11, %p85_p8  ;;  %p180_p3 = scmp.lt.s32.totalorder %s904_s20, 3 }
  0x1e   : > { %s194_s9 = sshll.u32 %s1143_s0, 4  ;;  %s908_s11 = smov [#allocation2]   ;;  %s195_s9 = int_to_ptr.hbm [resolvable:$true] %s194_s9 }
  0x1f   : > { %p181_p5 = pnand %p582_p12, %p180_p3  ;;  %s196_s12 = sshll.u32 %s908_s11, 4  ;;  %s197_s12 = int_to_ptr.vmem [resolvable:$true] %s196_s12 }
  0x20   : > { %631 = dma.hbm_to_vmem [thread:$0]  (!%p995_p7), %s247_s23, 1024, %s249_s30, %s1002_s14, %s906_s22, %s906_s22, %s907_s24  }
  0x21   : > { %p621_p6 = pneg %p181_p5  ;;  %260 = sbr.rel (%p181_p5) target bundleno = 78 (0x4e), region = 32 }
  0x23   : > { %p622_p1 = pnand %p621_p6, %p86_p9 }
  0x25   : > { %624 = dma.hbm_to_vmem [thread:$0]  (!%p622_p1), %s195_s9, 1024, %s197_s12, [#allocation3], %s906_s22, %s906_s22, %s907_s24  }
  0x26   : > { %867 = dma.done.wait (%p86_p9), [#allocation3], 1024  }
  0x27   : > { %869 = vsyncadd (%p86_p9), [#allocation3], 4294966272  ;;  %s267_s13 = sand.u32 1, %s1011_s5   ;;  %s1057_s10 = sand.u32 1, %s888_s16  }
  0x28   : > { %s1060_s26 = sshll.u32 %s1057_s10, 6  ;;  %s268_s14 = scalar_lea.sflag [#allocation6], %s267_s13 }
  0x29   : > { %s271_s23 = scalar_lea.vmem [#allocation5], %s1060_s26 }
  0x2a   : > { %871 = dma.done.wait (%p1021_p13), %s268_s14, 2048  }
  0x2b   : > { %873 = vsyncadd (%p1021_p13), %s268_s14, 4294965248  ;;  %v322_v0 = vld [vmem:[#allocation2] sm:$0xff]  ;;  %v323_v2 = vld [vmem:[#allocation2 + $0x8] sm:$0xff]  ;;  %s1068_s22 = scalar_lea.vmem [#allocation8], %s1060_s26  ;;  %s281_s24 = scalar_lea.vmem [#allocation7], %s1060_s26 }
  0x2c   : > { %v330_v1 = vld [vmem:[%s271_s23] sm:$0xff]  ;;  %v331_v4 = vld [vmem:[%s271_s23 + $0x8] sm:$0xff]  ;;  %v324_v5 = vld [vmem:[#allocation2 + $0x10] sm:$0xff]  ;;  %s607_s30 = sshll.u32 %s896_s18, 6  ;;  %s398_s5 = sshll.u32 %s1068_s22, 4  ;;  %s1088_s5 = int_to_ptr.vmem [resolvable:$true] %s398_s5 }
  0x2d   : > { %v346_v3 = vadd.f32 %v330_v1, %v322_v0  ;;  %v332_v6 = vld [vmem:[%s271_s23 + $0x10] sm:$0xff]  ;;  %v347_v7 = vadd.f32 %v331_v4, %v323_v2  ;;  %v325_v9 = vld [vmem:[#allocation2 + $0x18] sm:$0xff]  ;;  %v326_v11 = vld [vmem:[#allocation2 + $0x20] sm:$0xff]  ;;  %s397_s7 = scalar_lea.hbm %s1146_s3, %s607_s30  ;;  %s316_s8 = scalar_lea.vmem [#allocation9], %s1060_s26 }
  0x2e   : > { %v348_v8 = vadd.f32 %v332_v6, %v324_v5  ;;  %v333_v10 = vld [vmem:[%s271_s23 + $0x18] sm:$0xff]  ;;  %v334_v13 = vld [vmem:[%s271_s23 + $0x20] sm:$0xff]  ;;  %v327_v14 = vld [vmem:[#allocation2 + $0x28] sm:$0xff]  ;;  %s417_s9 = sshll.u32 %s316_s8, 4  ;;  %s416_s12 = scalar_lea.hbm %s1147_s4, %s607_s30  ;;  %s1090_s9 = int_to_ptr.vmem [resolvable:$true] %s417_s9 }
  0x2f   : > { %354 = vst [vmem:[%s1068_s22] sm:$0xff] %v346_v3  ;;  %v349_v12 = vadd.f32 %v333_v10, %v325_v9  ;;  %v335_v15 = vld [vmem:[%s271_s23 + $0x28] sm:$0xff]  ;;  %v350_v16 = vadd.f32 %v334_v13, %v326_v11  ;;  %v328_v18 = vld [vmem:[#allocation2 + $0x30] sm:$0xff]  ;;  %v329_v20 = vld [vmem:[#allocation2 + $0x38] sm:$0xff]  ;;  %s400_s13 = sshll.u32 %s397_s7, 4  ;;  %s419_s26 = sshll.u32 %s416_s12, 4  ;;  %s401_s13 = int_to_ptr.hbm [resolvable:$true] %s400_s13  ;;  %s1092_s26 = int_to_ptr.hbm [resolvable:$true] %s419_s26 }
  0x30   : > { %355 = vst [vmem:[%s1068_s22 + $0x8] sm:$0xff] %v347_v7  ;;  %v351_v17 = vadd.f32 %v335_v15, %v327_v14  ;;  %v336_v19 = vld [vmem:[%s271_s23 + $0x30] sm:$0xff]  ;;  %v337_v22 = vld [vmem:[%s271_s23 + $0x38] sm:$0xff]  ;;  %v338_v23 = vld [vmem:[%s281_s24] sm:$0xff]  ;;  %s379_s14 = scalar_lea.sflag [#allocation4], %s1057_s10  ;;  %s800_s23 = sshra.s32 %s401_s13, 4  ;;  %s801_s23 = int_to_ptr.hbm [resolvable:$true] %s800_s23 }
  0x31   : > { %356 = vst [vmem:[%s1068_s22 + $0x10] sm:$0xff] %v348_v8  ;;  %v352_v21 = vadd.f32 %v336_v19, %v328_v18  ;;  %v339_v24 = vld [vmem:[%s281_s24 + $0x8] sm:$0xff]  ;;  %v353_v25 = vadd.f32 %v337_v22, %v329_v20  ;;  %v340_v26 = vld [vmem:[%s281_s24 + $0x10] sm:$0xff]  ;;  %v362_v27 = vadd.f32 %v338_v23, %v322_v0  ;;  %v341_v28 = vld [vmem:[%s281_s24 + $0x18] sm:$0xff]  ;;  %s806_s29 = scalar_lea.hbm %s1146_s3, 128  ;;  %p807_p10 = scmp.lt.s32.totalorder %s801_s23, %s1146_s3 }
  0x32   : > { %357 = vst [vmem:[%s1068_s22 + $0x18] sm:$0xff] %v349_v12  ;;  %v363_v29 = vadd.f32 %v339_v24, %v323_v2  ;;  %v342_v30 = vld [vmem:[%s281_s24 + $0x20] sm:$0xff]  ;;  %v364_v31 = vadd.f32 %v340_v26, %v324_v5  ;;  %v343_v32 = vld [vmem:[%s281_s24 + $0x28] sm:$0xff]  ;;  %v365_v33 = vadd.f32 %v341_v28, %v325_v9  ;;  %v344_v34 = vld [vmem:[%s281_s24 + $0x30] sm:$0xff] }
  0x33   : > { %358 = vst [vmem:[%s1068_s22 + $0x20] sm:$0xff] %v350_v16  ;;  %v366_v35 = vadd.f32 %v342_v30, %v326_v11  ;;  %v345_v36 = vld [vmem:[%s281_s24 + $0x38] sm:$0xff]  ;;  %v367_v37 = vadd.f32 %v343_v32, %v327_v14  ;;  %v368_v38 = vadd.f32 %v344_v34, %v328_v18 }
  0x34   : > { %359 = vst [vmem:[%s1068_s22 + $0x28] sm:$0xff] %v351_v17  ;;  %v369_v39 = vadd.f32 %v345_v36, %v329_v20 }
  0x35   : > { %360 = vst [vmem:[%s1068_s22 + $0x30] sm:$0xff] %v352_v21 }
  0x36   : > { %361 = vst [vmem:[%s1068_s22 + $0x38] sm:$0xff] %v353_v25  ;;  %s802_s22 = scalar_lea.hbm %s801_s23, 64 }
  0x37   : > { %370 = vst [vmem:[%s316_s8] sm:$0xff] %v362_v27  ;;  %p803_p7 = scmp.ne.s32.totalorder %s801_s23, %s802_s22  ;;  %p808_p11 = scmp.lt.s32.totalorder %s806_s29, %s802_s22 }
  0x38   : > { %371 = vst [vmem:[%s316_s8 + $0x8] sm:$0xff] %v363_v29 }
  0x39   : > { %372 = vst [vmem:[%s316_s8 + $0x10] sm:$0xff] %v364_v31  ;;  %p804_p8 = pnand %p803_p7, %p1028_p0  ;;  %p809_p12 = por %p808_p11, %p807_p10 }
  0x3a   : > { %373 = vst [vmem:[%s316_s8 + $0x18] sm:$0xff] %v365_v33 }
  0x3b   : > { %374 = vst [vmem:[%s316_s8 + $0x20] sm:$0xff] %v366_v35  ;;  %p805_p9 = pneg %p804_p8 }
  0x3c   : > { %375 = vst [vmem:[%s316_s8 + $0x28] sm:$0xff] %v367_v37 }
  0x3d   : > { %376 = vst [vmem:[%s316_s8 + $0x30] sm:$0xff] %v368_v38  ;;  %p810_p13 = pnand %p809_p12, %p805_p9 }
  0x3e   : > { %377 = vst [vmem:[%s316_s8 + $0x38] sm:$0xff] %v369_v39 }
  0x3f   : > { %813 = shalt.err (!%p810_p13)
}
  0x40   : > { %s909_s8 = smov 256   ;;  %s910_s18 = smov 16  }
  0x41   : > { %617 = dma.vmem_to_hbm [thread:$0]  (%p1028_p0), %s1088_s5, 1024, %s401_s13, %s379_s14, %s909_s8, %s909_s8, %s910_s18  }
  0x42   : > { %s384_s11 = scalar_lea.sflag [#allocation10], %s1057_s10  ;;  %s828_s12 = sshra.s32 %s1092_s26, 4  ;;  %s829_s12 = int_to_ptr.hbm [resolvable:$true] %s828_s12 }
  0x43   : > { %s830_s24 = scalar_lea.hbm %s829_s12, 64  ;;  %s834_s30 = scalar_lea.hbm %s1147_s4, 128 }
  0x44   : > { %p831_p3 = scmp.ne.s32.totalorder %s829_s12, %s830_s24  ;;  %p835_p1 = scmp.lt.s32.totalorder %s829_s12, %s1147_s4 }
  0x45   : > { %p836_p7 = scmp.lt.s32.totalorder %s834_s30, %s830_s24 }
  0x46   : > { %p832_p5 = pnand %p831_p3, %p1028_p0 }
  0x47   : > { %p837_p8 = por %p836_p7, %p835_p1 }
  0x48   : > { %p833_p6 = pneg %p832_p5 }
  0x4a   : > { %p838_p9 = pnand %p837_p8, %p833_p6 }
  0x4c   : > { %841 = shalt.err (!%p838_p9)
}
  0x4d   : > { %618 = dma.vmem_to_hbm [thread:$0]  (%p1028_p0), %s1090_s9, 1024, %s1092_s26, %s384_s11, %s909_s8, %s909_s8, %s910_s18  }
  0x4e PF: > { %s434_s10 = sand.u32 1, %s884_s15   ;;  %p633_p10 = pnand %p584_p4, %p1032_p2 }
  0x4f   : > { %s435_s5 = scalar_lea.sflag [#allocation4], %s434_s10 }
  0x50   : > { %p634_p11 = pneg %p633_p10 }
  0x52   : > { %875 = dma.done.wait (%p634_p11), %s435_s5, 1024  }
  0x53   : > { %877 = vsyncadd (%p634_p11), %s435_s5, 4294966272  ;;  %s445_s13 = scalar_lea.sflag [#allocation10], %s434_s10 }
  0x54   : > { %879 = dma.done.wait (%p634_p11), %s445_s13, 1024  }
  0x55   : > { %881 = vsyncadd (%p634_p11), %s445_s13, 4294966272  ;;  %s25_s20 = sadd.s32 1, %s904_s20   ;;  %s1153_s15 = smov %s888_s16 }
  0x56   : > { %p22_p12 = scmp.ge.s32.totalorder %s25_s20, 4   ;;  %s1154_s16 = smov %s892_s17 }
  0x57   : > { %s1155_s17 = smov %s987_s27  ;;  %s1156_s18 = smov %s900_s19 }
  0x58   : > { %s1157_s19 = smov %s1159_s21  ;;  %24 = sbr.rel (!%p22_p12) target bundleno = 9 (0x9), region = 111 }
  0x5d   :  { %451 = vsyncpa [#allocation3], 1 }
  0x5e   :  { %453 = vsyncpa [#allocation3 + $0x1], 1 }
  0x5f   :  { %454 = vsyncpa [#allocation6], 1 }
  0x60   :  { %456 = vsyncpa [#allocation6 + $0x1], 1 }
  0x61   :  { %457 = vsyncpa [#allocation4], 1 }
  0x62   :  { %459 = vsyncpa [#allocation4 + $0x1], 1 }
  0x63   :  { %460 = vsyncpa [#allocation10], 1 }
  0x64   :  { %462 = vsyncpa [#allocation10 + $0x1], 1 }

</bundles_post_ra>
